<compile_context>
chip_gen: v5e
topology: v5e:2x2
jax: 0.10.0
libtpu: 0.0.40
codegen_flags: <defaults>
</compile_context>

<pallas_src>
import functools

import jax
import jax.numpy as jnp
from jax import lax
from jax.experimental import pallas as pl
from jax.experimental.pallas import tpu as pltpu

C = 128          # fixed by the module (nn.Conv2d(128, 128 // 16, 1))
RATIO = 16
CR = C // RATIO  # 8

_LANE = 128
# Per-tile x budget (bytes). x tiles are double-buffered, so 2x this must stay
# under the smallest default scoped-VMEM limit (16 MiB on v5e).
_X_TILE_BYTES = 6 * 1024 * 1024


def _channel_attention_kernel(x_ref, w1_ref, w2_ref, o_ref,
                              sum_acc, max_acc, *, hw, needs_mask):
    k = pl.program_id(1)
    nk = pl.num_programs(1)
    tk = x_ref.shape[-1]
    n_chunks = tk // _LANE

    @pl.when(k == 0)
    def _():
        sum_acc[...] = jnp.zeros(sum_acc.shape, sum_acc.dtype)
        max_acc[...] = jnp.full(max_acc.shape, -jnp.inf, max_acc.dtype)

    # Accumulate (TB, C, 128)-shaped partials with VPU adds / maxes only;
    # the single cross-lane reduce happens once in the finalize step.
    s = sum_acc[...]
    m = max_acc[...]
    base = k * tk
    for j in range(n_chunks):
        chunk = x_ref[:, :, pl.ds(j * _LANE, _LANE)].astype(jnp.float32)
        if needs_mask:
            lane = lax.broadcasted_iota(jnp.int32, chunk.shape, 2) + (base + j * _LANE)
            valid = lane < hw
            s = s + jnp.where(valid, chunk, 0.0)
            m = jnp.maximum(m, jnp.where(valid, chunk, -jnp.inf))
        else:
            s = s + chunk
            m = jnp.maximum(m, chunk)
    sum_acc[...] = s
    max_acc[...] = m

    @pl.when(k == nk - 1)
    def _():
        # AdaptiveAvgPool2d(1) + AdaptiveMaxPool2d(1)  ->  (TB, C)
        pooled = (jnp.sum(sum_acc[...], axis=-1) * (1.0 / hw)
                  + jnp.max(max_acc[...], axis=-1))
        # fc1 (1x1 conv, no bias): weight is lane-dense (CR, C); contract over C.
        h = lax.dot_general(pooled, w1_ref[...],
                            dimension_numbers=(((1,), (1,)), ((), ())),
                            preferred_element_type=jnp.float32)
        h = jnp.maximum(h, 0.0)
        # fc2 (1x1 conv, no bias): weight is lane-dense (CR, C).
        logits = jnp.dot(h, w2_ref[...], preferred_element_type=jnp.float32)
        # Softmax2d: softmax over the channel dim (spatial is 1x1 here).
        mx = jnp.max(logits, axis=-1, keepdims=True)
        e = jnp.exp(logits - mx)
        o_ref[...] = e * pl.reciprocal(jnp.sum(e, axis=-1, keepdims=True),
                                       approx=False)


def channel_attention(x, w_fc1, w_fc2):
    """x: (B, 128, H, W). w_fc1: (8, 128, 1, 1). w_fc2: (128, 8, 1, 1)."""
    B, Cin, H, W = x.shape
    assert Cin == C
    HW = H * W

    x_flat = x.reshape(B, C, HW)
    w1 = w_fc1.reshape(CR, C).astype(jnp.float32)      # (8, 128) lane-dense
    w2t = w_fc2.reshape(C, CR).T.astype(jnp.float32)   # (8, 128) lane-dense

    # Batch tile: the (8,128) rule only constrains the last two block dims;
    # the out block is (TB, C), so TB must be a multiple of 8 or the full B.
    TB = B if B <= 8 else 8

    # Spatial tile: lane-dense multiple of 128, sized so a double-buffered x
    # tile fits comfortably in the default scoped VMEM on all generations.
    itemsize = jnp.dtype(x_flat.dtype).itemsize
    tk = max(_LANE, (_X_TILE_BYTES // (TB * C * itemsize)) // _LANE * _LANE)
    hw_pad = pl.cdiv(HW, _LANE) * _LANE
    tk = min(tk, hw_pad)
    needs_mask = (HW % tk) != 0

    grid = (pl.cdiv(B, TB), pl.cdiv(HW, tk))

    kernel = functools.partial(_channel_attention_kernel,
                               hw=HW, needs_mask=needs_mask)

    out = pl.pallas_call(
        kernel,
        out_shape=jax.ShapeDtypeStruct((B, C), jnp.float32),
        grid_spec=pltpu.PrefetchScalarGridSpec(
            num_scalar_prefetch=0,
            grid=grid,
            in_specs=[
                pl.BlockSpec((TB, C, tk), lambda b, k: (b, 0, k)),
                pl.BlockSpec((CR, C), lambda b, k: (0, 0)),
                pl.BlockSpec((CR, C), lambda b, k: (0, 0)),
            ],
            out_specs=pl.BlockSpec((TB, C), lambda b, k: (b, 0)),
            scratch_shapes=[
                pltpu.VMEM((TB, C, _LANE), jnp.float32),  # running sum
                pltpu.VMEM((TB, C, _LANE), jnp.float32),  # running max
            ],
        ),
        compiler_params=pltpu.CompilerParams(
            dimension_semantics=("parallel", "arbitrary")),
    )(x_flat, w1, w2t)

    return out.reshape(B, C, 1, 1)


def _reference(x, w_fc1, w_fc2):
    # Pure-JAX reference for sanity checking.
    pooled = jnp.mean(x, axis=(2, 3)) + jnp.max(x, axis=(2, 3))  # (B, C)
    w1 = w_fc1.reshape(CR, C)
    w2 = w_fc2.reshape(C, CR)
    h = jnp.maximum(pooled @ w1.T, 0.0)
    logits = h @ w2.T
    return jax.nn.softmax(logits, axis=-1).reshape(x.shape[0], C, 1, 1)


if __name__ == "__main__":
    key = jax.random.PRNGKey(0)
    kx, k1, k2 = jax.random.split(key, 3)

    B, Hs, Ws = 2, 16, 16
    x = jax.random.normal(kx, (B, C, Hs, Ws), dtype=jnp.float32)
    # Deterministic synthetic weights (kaiming-ish scale).
    w_fc1 = jax.random.normal(k1, (CR, C, 1, 1), dtype=jnp.float32) * (2.0 / C) ** 0.5
    w_fc2 = jax.random.normal(k2, (C, CR, 1, 1), dtype=jnp.float32) * (2.0 / CR) ** 0.5

    out = jax.block_until_ready(channel_attention(x, w_fc1, w_fc2))

    ref = _reference(x, w_fc1, w_fc2)
    assert out.shape == (B, C, 1, 1)
    assert jnp.allclose(out, ref, atol=1e-5, rtol=1e-5), "mismatch vs reference"

    print("KERNEL_OK")
</pallas_src>

<mosaic_0001>
module attributes {stable_mosaic.version = 11 : i64} {
  func.func @_channel_attention_kernel(%arg0: i32, %arg1: i32, %arg2: memref<2x128x256xf32, #tpu.memory_space<vmem>>, %arg3: memref<8x128xf32, #tpu.memory_space<vmem>>, %arg4: memref<8x128xf32, #tpu.memory_space<vmem>>, %arg5: memref<2x128xf32, #tpu.memory_space<vmem>>, %arg6: memref<2x128x128xf32, #tpu.memory_space<vmem>>, %arg7: memref<2x128x128xf32, #tpu.memory_space<vmem>>) attributes {dimension_semantics = [#tpu.dimension_semantics<parallel>, #tpu.dimension_semantics<arbitrary>], iteration_bounds = array<i64: 1, 1>, scalar_prefetch = 0 : i64, scratch_operands = 2 : i64, tpu.core_type = #tpu.core_type<tc>, window_params = [{transform_indices = @transform_0, window_bounds = array<i64: 2, 128, 256>}, {pipeline_mode = #tpu.pipeline_mode<synchronous>, transform_indices = @transform_1, window_bounds = array<i64: 8, 128>}, {pipeline_mode = #tpu.pipeline_mode<synchronous>, transform_indices = @transform_2, window_bounds = array<i64: 8, 128>}, {transform_indices = @transform_3, window_bounds = array<i64: 2, 128>}]} {
    %c0_i32 = arith.constant 0 : i32
    %0 = arith.cmpi eq, %arg1, %c0_i32 : i32
    %1 = arith.extui %0 : i1 to i32
    %c0_i32_0 = arith.constant 0 : i32
    %2 = arith.cmpi ne, %1, %c0_i32_0 : i32
    scf.if %2 {
      %cst = arith.constant 0.000000e+00 : f32
      %16 = vector.broadcast %cst : f32 to vector<2x128x128xf32>
      %c0_19 = arith.constant 0 : index
      %c0_20 = arith.constant 0 : index
      %c0_21 = arith.constant 0 : index
      %17 = vector.load %arg6[%c0_19, %c0_20, %c0_21] : memref<2x128x128xf32, #tpu.memory_space<vmem>>, vector<2x128x128xf32>
      tpu.vector_store %arg6[%c0_19, %c0_20, %c0_21], %16 {strides = array<i32>} : memref<2x128x128xf32, #tpu.memory_space<vmem>>, vector<2x128x128xf32>,
      %cst_22 = arith.constant 0xFF800000 : f32
      %18 = vector.broadcast %cst_22 : f32 to vector<2x128x128xf32>
      %c0_23 = arith.constant 0 : index
      %c0_24 = arith.constant 0 : index
      %c0_25 = arith.constant 0 : index
      %19 = vector.load %arg7[%c0_23, %c0_24, %c0_25] : memref<2x128x128xf32, #tpu.memory_space<vmem>>, vector<2x128x128xf32>
      tpu.vector_store %arg7[%c0_23, %c0_24, %c0_25], %18 {strides = array<i32>} : memref<2x128x128xf32, #tpu.memory_space<vmem>>, vector<2x128x128xf32>,
    } else {
    }
    %c0 = arith.constant 0 : index
    %c0_1 = arith.constant 0 : index
    %c0_2 = arith.constant 0 : index
    %3 = vector.load %arg6[%c0, %c0_1, %c0_2] : memref<2x128x128xf32, #tpu.memory_space<vmem>>, vector<2x128x128xf32>
    %c0_3 = arith.constant 0 : index
    %c0_4 = arith.constant 0 : index
    %c0_5 = arith.constant 0 : index
    %4 = vector.load %arg7[%c0_3, %c0_4, %c0_5] : memref<2x128x128xf32, #tpu.memory_space<vmem>>, vector<2x128x128xf32>
    %c0_6 = arith.constant 0 : index
    %c0_7 = arith.constant 0 : index
    %c0_8 = arith.constant 0 : index
    %5 = vector.load %arg2[%c0_6, %c0_7, %c0_8] : memref<2x128x256xf32, #tpu.memory_space<vmem>>, vector<2x128x128xf32>
    %6 = arith.addf %3, %5 : vector<2x128x128xf32>
    %7 = arith.maximumf %4, %5 : vector<2x128x128xf32>
    %c0_9 = arith.constant 0 : index
    %c0_10 = arith.constant 0 : index
    %c128 = arith.constant 128 : index
    %8 = vector.load %arg2[%c0_9, %c0_10, %c128] : memref<2x128x256xf32, #tpu.memory_space<vmem>>, vector<2x128x128xf32>
    %9 = arith.addf %6, %8 : vector<2x128x128xf32>
    %10 = arith.maximumf %7, %8 : vector<2x128x128xf32>
    %c0_11 = arith.constant 0 : index
    %c0_12 = arith.constant 0 : index
    %c0_13 = arith.constant 0 : index
    %11 = vector.load %arg6[%c0_11, %c0_12, %c0_13] : memref<2x128x128xf32, #tpu.memory_space<vmem>>, vector<2x128x128xf32>
    tpu.vector_store %arg6[%c0_11, %c0_12, %c0_13], %9 {strides = array<i32>} : memref<2x128x128xf32, #tpu.memory_space<vmem>>, vector<2x128x128xf32>,
    %c0_14 = arith.constant 0 : index
    %c0_15 = arith.constant 0 : index
    %c0_16 = arith.constant 0 : index
    %12 = vector.load %arg7[%c0_14, %c0_15, %c0_16] : memref<2x128x128xf32, #tpu.memory_space<vmem>>, vector<2x128x128xf32>
    tpu.vector_store %arg7[%c0_14, %c0_15, %c0_16], %10 {strides = array<i32>} : memref<2x128x128xf32, #tpu.memory_space<vmem>>, vector<2x128x128xf32>,
    %c0_i32_17 = arith.constant 0 : i32
    %13 = arith.cmpi eq, %arg1, %c0_i32_17 : i32
    %14 = arith.extui %13 : i1 to i32
    %c0_i32_18 = arith.constant 0 : i32
    %15 = arith.cmpi ne, %14, %c0_i32_18 : i32
    scf.if %15 {
      %c0_19 = arith.constant 0 : index
      %c0_20 = arith.constant 0 : index
      %c0_21 = arith.constant 0 : index
      %16 = vector.load %arg6[%c0_19, %c0_20, %c0_21] : memref<2x128x128xf32, #tpu.memory_space<vmem>>, vector<2x128x128xf32>
      %cst = arith.constant dense<0.000000e+00> : vector<2x128xf32>
      %17 = vector.multi_reduction <add>, %16, %cst [2] : vector<2x128x128xf32> to vector<2x128xf32>
      %cst_22 = arith.constant 3.906250e-03 : f32
      %18 = vector.broadcast %cst_22 : f32 to vector<2x128xf32>
      %19 = arith.mulf %17, %18 : vector<2x128xf32>
      %c0_23 = arith.constant 0 : index
      %c0_24 = arith.constant 0 : index
      %c0_25 = arith.constant 0 : index
      %20 = vector.load %arg7[%c0_23, %c0_24, %c0_25] : memref<2x128x128xf32, #tpu.memory_space<vmem>>, vector<2x128x128xf32>
      %cst_26 = arith.constant dense<0xFF800000> : vector<2x128xf32>
      %21 = vector.multi_reduction <maximumf>, %20, %cst_26 [2] : vector<2x128x128xf32> to vector<2x128xf32>
      %22 = arith.addf %19, %21 : vector<2x128xf32>
      %c0_27 = arith.constant 0 : index
      %c0_28 = arith.constant 0 : index
      %23 = vector.load %arg3[%c0_27, %c0_28] : memref<8x128xf32, #tpu.memory_space<vmem>>, vector<8x128xf32>
      %cst_29 = arith.constant dense<0.000000e+00> : vector<2x8xf32>
      %24 = tpu.matmul %22, %23, %cst_29 {dimension_numbers = #tpu.dot_dimension_numbers<[1], [1], [0], [0], [0, 0, 1, 0], [], []>} : vector<2x128xf32>, vector<8x128xf32>, vector<2x8xf32> -> vector<2x8xf32>
      %cst_30 = arith.constant 0.000000e+00 : f32
      %25 = vector.broadcast %cst_30 : f32 to vector<2x8xf32>
      %26 = arith.maximumf %24, %25 : vector<2x8xf32>
      %c0_31 = arith.constant 0 : index
      %c0_32 = arith.constant 0 : index
      %27 = vector.load %arg4[%c0_31, %c0_32] : memref<8x128xf32, #tpu.memory_space<vmem>>, vector<8x128xf32>
      %cst_33 = arith.constant dense<0.000000e+00> : vector<2x128xf32>
      %28 = tpu.matmul %26, %27, %cst_33 {dimension_numbers = #tpu.dot_dimension_numbers<[1], [0], [0], [1], [0, 0, 1, 1], [], []>} : vector<2x8xf32>, vector<8x128xf32>, vector<2x128xf32> -> vector<2x128xf32>
      %cst_34 = arith.constant dense<0xFF800000> : vector<2xf32>
      %29 = vector.multi_reduction <maximumf>, %28, %cst_34 [1] : vector<2x128xf32> to vector<2xf32>
      %30 = vector.shape_cast %29 : vector<2xf32> to vector<2x1xf32>
      %31 = vector.broadcast %30 : vector<2x1xf32> to vector<2x128xf32>
      %32 = arith.subf %28, %31 : vector<2x128xf32>
      %33 = math.exp %32 : vector<2x128xf32>
      %cst_35 = arith.constant dense<0.000000e+00> : vector<2xf32>
      %34 = vector.multi_reduction <add>, %33, %cst_35 [1] : vector<2x128xf32> to vector<2xf32>
      %35 = vector.shape_cast %34 : vector<2xf32> to vector<2x1xf32>
      %36 = tpu.reciprocal %35 : vector<2x1xf32> -> vector<2x1xf32>
      %37 = vector.broadcast %36 : vector<2x1xf32> to vector<2x128xf32>
      %38 = arith.mulf %33, %37 : vector<2x128xf32>
      %c0_36 = arith.constant 0 : index
      %c0_37 = arith.constant 0 : index
      %39 = vector.load %arg5[%c0_36, %c0_37] : memref<2x128xf32, #tpu.memory_space<vmem>>, vector<2x128xf32>
      tpu.vector_store %arg5[%c0_36, %c0_37], %38 {strides = array<i32>} : memref<2x128xf32, #tpu.memory_space<vmem>>, vector<2x128xf32>,
    } else {
    }
    return
  }
  func.func @transform_0(%arg0: i32, %arg1: i32) -> (i32, i32, i32) {
    %c0_i32 = arith.constant 0 : i32
    %c0_i32_0 = arith.constant 0 : i32
    return %arg0, %c0_i32, %arg1 : i32, i32, i32
  }
  func.func @transform_1(%arg0: i32, %arg1: i32) -> (i32, i32) {
    %c0_i32 = arith.constant 0 : i32
    %c0_i32_0 = arith.constant 0 : i32
    %c0_i32_1 = arith.constant 0 : i32
    return %c0_i32, %c0_i32_0 : i32, i32
  }
  func.func @transform_2(%arg0: i32, %arg1: i32) -> (i32, i32) {
    %c0_i32 = arith.constant 0 : i32
    %c0_i32_0 = arith.constant 0 : i32
    %c0_i32_1 = arith.constant 0 : i32
    return %c0_i32, %c0_i32_0 : i32, i32
  }
  func.func @transform_3(%arg0: i32, %arg1: i32) -> (i32, i32) {
    %c0_i32 = arith.constant 0 : i32
    %c0_i32_0 = arith.constant 0 : i32
    return %arg0, %c0_i32 : i32, i32
  }
}

</mosaic_0001>

<bundles_post_ra>
// kernel: tpu_custom_call.1
= control target key start
LH: loop header
LB: loop body
LE: loop exit
PB: predicated region body
PF: predicated region fallthrough
CT: control target
= control target key end

     0   :  { %8 = vsyncpa [#allocation5], 0  ;;  %s1164_s0 = inlined_call_operand.hbm [shape: f32[2,128,256], index: 0, kind: input, shape index: {}]   ;;  %s1165_s1 = inlined_call_operand.hbm [shape: f32[8,128], index: 1, kind: input, shape index: {}]   ;;  %s1166_s2 = inlined_call_operand.hbm [shape: f32[8,128], index: 2, kind: input, shape index: {}]   ;;  %s1167_s3 = inlined_call_operand.hbm [shape: f32[2,128], index: 3, kind: output, shape index: {}]  }
   0x1   :  { %9 = vsyncpa [#allocation8], 0  ;;  %s29_s14 = sshll.u32 %s1165_s1, 4  ;;  %s30_s14 = int_to_ptr.hbm [resolvable:$true] %s29_s14 }
   0x2   :  { %10 = vsyncpa [#allocation6], 0  ;;  %s1038_s15 = smov [#allocation7]   ;;  %s15_s19 = sshll.u32 %s1164_s0, 4  ;;  %s16_s19 = int_to_ptr.hbm [resolvable:$true] %s15_s19 }
   0x3   :  { %s31_s16 = sshll.u32 %s1038_s15, 4  ;;  %s1039_s20 = smov [#allocation4]   ;;  %s32_s16 = int_to_ptr.vmem [resolvable:$true] %s31_s16 }
   0x4   :  { %34 = dma.hbm_to_vmem [thread:$0]  %s30_s14, 128, %s32_s16, [#allocation8]  }
   0x5   :  { %s17_s21 = sshll.u32 %s1039_s20, 4  ;;  %s1040_s22 = smov 256   ;;  %s18_s21 = int_to_ptr.vmem [resolvable:$true] %s17_s21 }
   0x6   :  { %s1041_s23 = smov 16   ;;  %s40_s1 = sshll.u32 %s1166_s2, 4  ;;  %s41_s1 = int_to_ptr.hbm [resolvable:$true] %s40_s1 }
   0x7   :  { %23 = dma.hbm_to_vmem [thread:$0]  %s16_s19, 8192, %s18_s21, [#allocation5], %s1040_s22, %s1040_s22, %s1041_s23  }
   0x8   :  { %s1042_s26 = smov [#allocation9]  }
   0x9   :  { %s42_s27 = sshll.u32 %s1042_s26, 4  ;;  %s43_s27 = int_to_ptr.vmem [resolvable:$true] %s42_s27 }
   0xa   :  { %45 = dma.hbm_to_vmem [thread:$0]  %s41_s1, 128, %s43_s27, [#allocation8]  }
   0xb   :  { %1032 = dma.done.wait [#allocation5], 8192  }
   0xc   :  { %1033 = vsyncadd [#allocation5], 4294959104 }
   0xd   :  { %1034 = dma.done.wait [#allocation8], 256  }
   0xe   :  { %1035 = vsyncadd [#allocation8], 4294967040  ;;  %v206_v0 = vld [vmem:[#allocation4 + $0x100] sm:$0xff]  ;;  %v302_v1 = vld [vmem:[#allocation4 + $0x108] sm:$0xff]  ;;  %vm743_vm0 = vcmask 130112   ;;  %vm747_vm1 = vcmask 195712  }
   0xf   :  { %v192_v2 = vld [vmem:[#allocation4 + $0x20] sm:$0xff]  ;;  %v334_v3 = vadd.f32 %v302_v1, %v206_v0  ;;  %v288_v4 = vld [vmem:[#allocation4 + $0x28] sm:$0xff]  ;;  %v207_v9 = vld [vmem:[#allocation4 + $0x110] sm:$0xff]  ;;  %v366_v25 = vmax.f32 %v206_v0, %v302_v1  ;;  %vm751_vm2 = vcmask 261312   ;;  %vm755_vm3 = vcmask 326912   ;;  %s1043_s0 = smov [#allocation10]  }
  0x10   :  { %v190_v5 = vld [vmem:[#allocation4] sm:$0xff]  ;;  %v286_v6 = vld [vmem:[#allocation4 + $0x8] sm:$0xff]  ;;  %v320_v7 = vadd.f32 %v288_v4, %v192_v2  ;;  %v303_v10 = vld [vmem:[#allocation4 + $0x118] sm:$0xff]  ;;  %v352_v33 = vmax.f32 %v192_v2, %v288_v4  ;;  %vm759_vm4 = vcmask 392512   ;;  %vm763_vm5 = vcmask 458112   ;;  %s912_s2 = sshll.u32 %s1043_s0, 4  ;;  %s913_s2 = int_to_ptr.vmem [resolvable:$true] %s912_s2 }
  0x11   :  { %v318_v8 = vadd.f32 %v286_v6, %v190_v5  ;;  %513 = vadd.xlane.f32.xlu1 %v334_v3  ;;  %v208_v11 = vld [vmem:[#allocation4 + $0x120] sm:$0xff]  ;;  %v304_v12 = vld [vmem:[#allocation4 + $0x128] sm:$0xff]  ;;  %v191_v13 = vld [vmem:[#allocation4 + $0x10] sm:$0xff]  ;;  %v335_v15 = vadd.f32 %v303_v10, %v207_v9  ;;  %v350_v23 = vmax.f32 %v190_v5, %v286_v6  ;;  %v367_v26 = vmax.f32 %v207_v9, %v303_v10  ;;  %s914_s30 = sshll.u32 %s1167_s3, 4  ;;  %s915_s30 = int_to_ptr.hbm [resolvable:$true] %s914_s30 }
  0x12   :  { %485 = vadd.xlane.f32.xlu2 %v320_v7  ;;  %v287_v14 = vld [vmem:[#allocation4 + $0x18] sm:$0xff]  ;;  %v336_v16 = vadd.f32 %v304_v12, %v208_v11  ;;  %v209_v18 = vld [vmem:[#allocation4 + $0x130] sm:$0xff]  ;;  %v210_v28 = vld [vmem:[#allocation4 + $0x140] sm:$0xff]  ;;  %v368_v41 = vmax.f32 %v208_v11, %v304_v12  ;;  %vm767_vm6 = vcmask 523712   ;;  %vm771_vm7 = vcmask 589312  }
  0x13   :  { %481 = vadd.xlane.f32.xlu0 %v318_v8  ;;  %v319_v17 = vadd.f32 %v287_v14, %v191_v13  ;;  %v305_v19 = vld [vmem:[#allocation4 + $0x138] sm:$0xff]  ;;  %v193_v20 = vld [vmem:[#allocation4 + $0x30] sm:$0xff]  ;;  %v351_v27 = vmax.f32 %v191_v13, %v287_v14  ;;  %v306_v29 = vld [vmem:[#allocation4 + $0x148] sm:$0xff]  ;;  %vm775_vm8 = vcmask 654912   ;;  %vm779_vm9 = vcmask 720512  }
  0x14   :  { %v289_v21 = vld [vmem:[#allocation4 + $0x38] sm:$0xff]  ;;  %v337_v22 = vadd.f32 %v305_v19, %v209_v18  ;;  %v194_v30 = vld [vmem:[#allocation4 + $0x40] sm:$0xff]  ;;  %v290_v31 = vld [vmem:[#allocation4 + $0x48] sm:$0xff]  ;;  %v338_v32 = vadd.f32 %v306_v29, %v210_v28  ;;  %v369_v44 = vmax.f32 %v209_v18, %v305_v19  ;;  %v370_v50 = vmax.f32 %v210_v28, %v306_v29 }
  0x15   :  { %v321_v24 = vadd.f32 %v289_v21, %v193_v20  ;;  %v322_v34 = vadd.f32 %v290_v31, %v194_v30  ;;  %v195_v35 = vld [vmem:[#allocation4 + $0x50] sm:$0xff]  ;;  %v291_v36 = vld [vmem:[#allocation4 + $0x58] sm:$0xff]  ;;  %v196_v42 = vld [vmem:[#allocation4 + $0x60] sm:$0xff]  ;;  %v353_v46 = vmax.f32 %v193_v20, %v289_v21  ;;  %v354_v49 = vmax.f32 %v194_v30, %v290_v31 }
  0x16   :  { %v211_v37 = vld [vmem:[#allocation4 + $0x150] sm:$0xff]  ;;  %v307_v38 = vld [vmem:[#allocation4 + $0x158] sm:$0xff]  ;;  %v323_v39 = vadd.f32 %v291_v36, %v195_v35  ;;  %v292_v43 = vld [vmem:[#allocation4 + $0x68] sm:$0xff]  ;;  %v355_v57 = vmax.f32 %v195_v35, %v291_v36  ;;  %vm783_vm10 = vcmask 786112   ;;  %vm787_vm11 = vcmask 851712  }
  0x17   :  { %v339_v40 = vadd.f32 %v307_v38, %v211_v37  ;;  %v324_v45 = vadd.f32 %v292_v43, %v196_v42  ;;  %v212_v47 = vld [vmem:[#allocation4 + $0x160] sm:$0xff]  ;;  %v308_v48 = vld [vmem:[#allocation4 + $0x168] sm:$0xff]  ;;  %v213_v52 = vld [vmem:[#allocation4 + $0x170] sm:$0xff]  ;;  %v371_v1 = vmax.f32 %v211_v37, %v307_v38  ;;  %v356_v6 = vmax.f32 %v196_v42, %v292_v43 }
  0x18   :  { %v340_v51 = vadd.f32 %v308_v48, %v212_v47  ;;  %v309_v53 = vld [vmem:[#allocation4 + $0x178] sm:$0xff]  ;;  %v197_v54 = vld [vmem:[#allocation4 + $0x70] sm:$0xff]  ;;  %v198_v59 = vld [vmem:[#allocation4 + $0x80] sm:$0xff]  ;;  %v372_v4 = vmax.f32 %v212_v47, %v308_v48  ;;  %vm791_vm12 = vcmask 917312   ;;  %vm795_vm13 = vcmask 982912  }
  0x19   :  { %515 = vadd.xlane.f32.xlu1 %v335_v15  ;;  %v293_v55 = vld [vmem:[#allocation4 + $0x78] sm:$0xff]  ;;  %v341_v56 = vadd.f32 %v309_v53, %v213_v52  ;;  %v294_v60 = vld [vmem:[#allocation4 + $0x88] sm:$0xff]  ;;  %v214_v61 = vld [vmem:[#allocation4 + $0x180] sm:$0xff]  ;;  %v373_v10 = vmax.f32 %v213_v52, %v309_v53  ;;  %vm799_vm14 = vcmask 1048512   ;;  %vm832_vm15 = vcmask 1041409  }
  0x1a   :  { %517 = vadd.xlane.f32.xlu2 %v336_v16  ;;  %v325_v58 = vadd.f32 %v293_v55, %v197_v54  ;;  %v310_v62 = vld [vmem:[#allocation4 + $0x188] sm:$0xff]  ;;  %v326_v63 = vadd.f32 %v294_v60, %v198_v59  ;;  %v199_v2 = vld [vmem:[#allocation4 + $0x90] sm:$0xff]  ;;  %v295_v3 = vld [vmem:[#allocation4 + $0x98] sm:$0xff]  ;;  %v357_v9 = vmax.f32 %v197_v54, %v293_v55 }
  0x1b   :  { %483 = vadd.xlane.f32.xlu0 %v319_v17  ;;  %v342_v0 = vadd.f32 %v310_v62, %v214_v61  ;;  %v327_v5 = vadd.f32 %v295_v3, %v199_v2  ;;  %v215_v7 = vld [vmem:[#allocation4 + $0x190] sm:$0xff]  ;;  %v311_v8 = vld [vmem:[#allocation4 + $0x198] sm:$0xff]  ;;  %v216_v12 = vld [vmem:[#allocation4 + $0x1a0] sm:$0xff]  ;;  %v358_v17 = vmax.f32 %v198_v59, %v294_v60  ;;  %v359_v30 = vmax.f32 %v199_v2, %v295_v3 }
  0x1c   :  { %v343_v11 = vadd.f32 %v311_v8, %v215_v7  ;;  %v312_v13 = vld [vmem:[#allocation4 + $0x1a8] sm:$0xff]  ;;  %v200_v14 = vld [vmem:[#allocation4 + $0xa0] sm:$0xff]  ;;  %v201_v19 = vld [vmem:[#allocation4 + $0xb0] sm:$0xff]  ;;  %v375_v28 = vmax.f32 %v215_v7, %v311_v8 }
  0x1d   :  { %v296_v15 = vld [vmem:[#allocation4 + $0xa8] sm:$0xff]  ;;  %v344_v16 = vadd.f32 %v312_v13, %v216_v12  ;;  %v297_v20 = vld [vmem:[#allocation4 + $0xb8] sm:$0xff]  ;;  %v217_v21 = vld [vmem:[#allocation4 + $0x1b0] sm:$0xff]  ;;  %v376_v37 = vmax.f32 %v216_v12, %v312_v13 }
  0x1e   :  { %v328_v18 = vadd.f32 %v296_v15, %v200_v14  ;;  %v218_v31 = vld [vmem:[#allocation4 + $0x1c0] sm:$0xff]  ;;  %v360_v36 = vmax.f32 %v200_v14, %v296_v15  ;;  %v1087_v42 = vld [vmem:[#allocation4 + $0xd8] sm:$0xff]  ;;  %v361_v47 = vmax.f32 %v201_v19, %v297_v20  ;;  %v1101_v52 = vld [vmem:[#allocation4 + $0x1e8] sm:$0xff] }
  0x21   :  { %519 = vadd.xlane.f32.xlu1 %v337_v22  ;;  %v313_v22 = vld [vmem:[#allocation4 + $0x1b8] sm:$0xff] }
  0x22   :  { %609 = vmax.xlane.f32.xlu2 %v350_v23  ;;  %v329_v23 = vadd.f32 %v297_v20, %v201_v19  ;;  %v221_v20 = vld [vmem:[#allocation4 + $0x1f0] sm:$0xff] }
  0x23   :  { %487 = vadd.xlane.f32.xlu0 %v321_v24  ;;  %v345_v24 = vadd.f32 %v313_v22, %v217_v21 }
  0x29   :  { %641 = vmax.xlane.f32.xlu1 %v366_v25  ;;  %v374_v25 = vmax.f32 %v214_v61, %v310_v62  ;;  %v377_v61 = vmax.f32 %v217_v21, %v313_v22  ;;  %v317_v21 = vld [vmem:[#allocation4 + $0x1f8] sm:$0xff] }
  0x2a   :  { %643 = vmax.xlane.f32.xlu2 %v367_v26  ;;  %v1073_v26 = vld [vmem:[#allocation4 + $0xc0] sm:$0xff] }
  0x2b   :  { %611 = vmax.xlane.f32.xlu0 %v351_v27  ;;  %v1075_v27 = vld [vmem:[#allocation4 + $0xc8] sm:$0xff] }
  0x2c   :  { %v330_v29 = vadd.f32 %v1075_v27, %v1073_v26  ;;  %v362_v13 = vmax.f32 %v1073_v26, %v1075_v27 }
  0x31   :  { %521 = vadd.xlane.f32.xlu1 %v338_v32  ;;  %v314_v32 = vld [vmem:[#allocation4 + $0x1c8] sm:$0xff] }
  0x32   :  { %613 = vmax.xlane.f32.xlu2 %v352_v33  ;;  %v346_v38 = vadd.f32 %v314_v32, %v218_v31 }
  0x33   :  { %489 = vadd.xlane.f32.xlu0 %v322_v34 }
  0x39   :  { %491 = vadd.xlane.f32.xlu1 %v323_v39  ;;  %v1081_v39 = vld [vmem:[#allocation4 + $0x1d0] sm:$0xff] }
  0x3a   :  { %523 = vadd.xlane.f32.xlu2 %v339_v40  ;;  %v1083_v40 = vld [vmem:[#allocation4 + $0x1d8] sm:$0xff] }
  0x3b   :  { %645 = vmax.xlane.f32.xlu0 %v368_v41  ;;  %v1085_v41 = vld [vmem:[#allocation4 + $0xd0] sm:$0xff] }
  0x3c   :  { %v331_v48 = vadd.f32 %v1087_v42, %v1085_v41  ;;  %v363_v27 = vmax.f32 %v1085_v41, %v1087_v42 }
  0x41   :  { %647 = vmax.xlane.f32.xlu1 %v369_v44 }
  0x42   :  { %493 = vadd.xlane.f32.xlu2 %v324_v45 }
  0x43   :  { %615 = vmax.xlane.f32.xlu0 %v353_v46  ;;  %v347_v46 = vadd.f32 %v1083_v40, %v1081_v39 }
  0x49   :  { %617 = vmax.xlane.f32.xlu1 %v354_v49  ;;  %v1095_v49 = vld [vmem:[#allocation4 + $0xe0] sm:$0xff] }
  0x4a   :  { %649 = vmax.xlane.f32.xlu2 %v370_v50  ;;  %v1097_v50 = vld [vmem:[#allocation4 + $0xe8] sm:$0xff] }
  0x4b   :  { %525 = vadd.xlane.f32.xlu0 %v340_v51  ;;  %v1099_v51 = vld [vmem:[#allocation4 + $0x1e0] sm:$0xff] }
  0x4c   :  { %v348_v60 = vadd.f32 %v1101_v52, %v1099_v51 }
  0x51   :  { %527 = vadd.xlane.f32.xlu1 %v341_v56 }
  0x52   :  { %619 = vmax.xlane.f32.xlu2 %v355_v57  ;;  %v332_v57 = vadd.f32 %v1097_v50, %v1095_v49 }
  0x53   :  { %495 = vadd.xlane.f32.xlu0 %v325_v58  ;;  %v738_v58 = vlaneseq }
  0x55   :  { %v1111_v62 = vand.u32 127, %v738_v58 }
  0x59   :  { %497 = vadd.xlane.f32.xlu1 %v326_v63 }
  0x5a   :  { %529 = vadd.xlane.f32.xlu2 %v342_v0  ;;  %v205_v0 = vld [vmem:[#allocation4 + $0xf0] sm:$0xff] }
  0x5b   :  { %651 = vmax.xlane.f32.xlu0 %v371_v1  ;;  %v301_v1 = vld [vmem:[#allocation4 + $0xf8] sm:$0xff] }
  0x5c   :  { %v333_v12 = vadd.f32 %v301_v1, %v205_v0  ;;  %v365_v41 = vmax.f32 %v205_v0, %v301_v1 }
  0x61   :  { %653 = vmax.xlane.f32.xlu1 %v372_v4 }
  0x62   :  { %499 = vadd.xlane.f32.xlu2 %v327_v5  ;;  %v741_v5 = vadd.s32 4294967288, %v1111_v62 }
  0x63   :  { %621 = vmax.xlane.f32.xlu0 %v356_v6 }
  0x69   :  { %623 = vmax.xlane.f32.xlu1 %v357_v9  ;;  %v378_v9 = vmax.f32 %v218_v31, %v314_v32 }
  0x6a   :  { %655 = vmax.xlane.f32.xlu2 %v373_v10 }
  0x6b   :  { %531 = vadd.xlane.f32.xlu0 %v343_v11 }
  0x71   :  { %533 = vadd.xlane.f32.xlu1 %v344_v16 }
  0x72   :  { %625 = vmax.xlane.f32.xlu2 %v358_v17 }
  0x73   :  { %501 = vadd.xlane.f32.xlu0 %v328_v18 }
  0x79   :  { %503 = vadd.xlane.f32.xlu1 %v329_v23 }
  0x7a   :  { %535 = vadd.xlane.f32.xlu2 %v345_v24  ;;  %v745_v24 = vadd.s32 4294967280, %v1111_v62 }
  0x7b   :  { %657 = vmax.xlane.f32.xlu0 %v374_v25 }
  0x81   :  { %659 = vmax.xlane.f32.xlu1 %v375_v28 }
  0x82   :  { %505 = vadd.xlane.f32.xlu2 %v330_v29  ;;  %v379_v29 = vmax.f32 %v1081_v39, %v1083_v40  ;;  %v364_v39 = vmax.f32 %v1095_v49, %v1097_v50 }
  0x83   :  { %627 = vmax.xlane.f32.xlu0 %v359_v30  ;;  %v349_v30 = vadd.f32 %v317_v21, %v221_v20 }
  0x84   :  { %v514_v33 = vpop.xlane.xlu1 %513 }
  0x85   :  { %v1079_v34 = vpop.xlane.xlu2 %485  ;;  %v561_v63 = vmul.f32 0.00390625, %v514_v33 }
  0x86   :  { %v482_v35 = vpop.xlane.xlu0 %481  ;;  %v547_v22 = vmul.f32 0.00390625, %v1079_v34 }
  0x87   :  { %v545_v53 = vmul.f32 0.00390625, %v482_v35 }
  0x89   :  { %629 = vmax.xlane.f32.xlu1 %v360_v36 }
  0x8a   :  { %661 = vmax.xlane.f32.xlu2 %v376_v37  ;;  %v380_v37 = vmax.f32 %v1099_v51, %v1101_v52 }
  0x8b   :  { %537 = vadd.xlane.f32.xlu0 %v346_v38 }
  0x8c   :  { %v516_v43 = vpop.xlane.xlu1 %515 }
  0x8d   :  { %v1089_v44 = vpop.xlane.xlu2 %517  ;;  %v562_v2 = vmul.f32 0.00390625, %v516_v43 }
  0x8e   :  { %v484_v45 = vpop.xlane.xlu0 %483  ;;  %v563_v33 = vmul.f32 0.00390625, %v1089_v44  ;;  %v749_v44 = vadd.s32 4294967272, %v1111_v62 }
  0x8f   :  { %v546_v3 = vmul.f32 0.00390625, %v484_v45 }
  0x91   :  { %539 = vadd.xlane.f32.xlu1 %v347_v46 }
  0x92   :  { %631 = vmax.xlane.f32.xlu2 %v361_v47 }
  0x93   :  { %507 = vadd.xlane.f32.xlu0 %v331_v48 }
  0x94   :  { %v1103_v54 = vpop.xlane.xlu1 %519 }
  0x95   :  { %v610_v55 = vpop.xlane.xlu2 %609  ;;  %v564_v43 = vmul.f32 0.00390625, %v1103_v54 }
  0x96   :  { %v1105_v56 = vpop.xlane.xlu0 %487  ;;  %v673_v59 = vadd.f32 %v610_v55, %v545_v53  ;;  %v381_v53 = vmax.f32 %v221_v20, %v317_v21  ;;  %v761_v21 = vadd.s32 4294967248, %v1111_v62 }
  0x97   :  { %v548_v45 = vmul.f32 0.00390625, %v1105_v56 }
  0x98   :  { %v740_v15 = vperm.slane %v673_v59, %v1111_v62  ;;  %v753_v59 = vadd.s32 4294967264, %v1111_v62 }
  0x99   :  { %509 = vadd.xlane.f32.xlu1 %v332_v57 }
  0x9a   :  { %541 = vadd.xlane.f32.xlu2 %v348_v60 }
  0x9b   :  { %663 = vmax.xlane.f32.xlu0 %v377_v61 }
  0x9c   :  { %v642_v4 = vpop.xlane.xlu1 %641 }
  0x9d   :  { %v689_v6 = vadd.f32 %v642_v4, %v561_v63  ;;  %v644_v7 = vpop.xlane.xlu2 %643 }
  0x9e   :  { %v612_v8 = vpop.xlane.xlu0 %611  ;;  %v690_v10 = vadd.f32 %v644_v7, %v562_v2  ;;  %v757_v7 = vadd.s32 4294967256, %v1111_v62 }
  0x9f   :  { %v674_v11 = vadd.f32 %v612_v8, %v546_v3  ;;  %v801_v14 = vperm.slane %v689_v6, %v1111_v62 }
  0xa0   :  { %v802_v16 = vperm.slane %v690_v10, %v741_v5 }
  0xa1   :  { %v742_v17 = vperm.slane %v674_v11, %v741_v5  ;;  %665 = vmax.xlane.f32.xlu1 %v378_v9 }
  0xa2   :  { %v803_v18 = vsel %vm743_vm0, %v802_v16, %v801_v14  ;;  %511 = vadd.xlane.f32.xlu2 %v333_v12 }
  0xa3   :  { %v744_v19 = vsel %vm743_vm0, %v742_v17, %v740_v15  ;;  %633 = vmax.xlane.f32.xlu0 %v362_v13  ;;  %vm857_vm0 = vcmask 64512  }
  0xa4   :  { %v522_v23 = vpop.xlane.xlu1 %521 }
  0xa5   :  { %v614_v25 = vpop.xlane.xlu2 %613  ;;  %v565_v54 = vmul.f32 0.00390625, %v522_v23 }
  0xa6   :  { %v490_v26 = vpop.xlane.xlu0 %489  ;;  %v675_v28 = vadd.f32 %v614_v25, %v547_v22 }
  0xa7   :  { %v549_v58 = vmul.f32 0.00390625, %v490_v26 }
  0xa8   :  { %v746_v31 = vperm.slane %v675_v28, %v745_v24 }
  0xa9   :  { %635 = vmax.xlane.f32.xlu1 %v363_v27 }
  0xaa   :  { %v748_v32 = vsel %vm747_vm1, %v746_v31, %v744_v19  ;;  %667 = vmax.xlane.f32.xlu2 %v379_v29 }
  0xab   :  { %543 = vadd.xlane.f32.xlu0 %v349_v30 }
  0xac   :  { %v492_v34 = vpop.xlane.xlu1 %491 }
  0xad   :  { %v524_v35 = vpop.xlane.xlu2 %523  ;;  %v550_v5 = vmul.f32 0.00390625, %v492_v34 }
  0xae   :  { %v646_v36 = vpop.xlane.xlu0 %645  ;;  %v566_v13 = vmul.f32 0.00390625, %v524_v35 }
  0xaf   :  { %v691_v38 = vadd.f32 %v646_v36, %v563_v33  ;;  %v765_v33 = vadd.s32 4294967240, %v1111_v62 }
  0xb1   :  { %v804_v40 = vperm.slane %v691_v38, %v745_v24  ;;  %669 = vmax.xlane.f32.xlu1 %v380_v37 }
  0xb2   :  { %639 = vmax.xlane.f32.xlu2 %v365_v41 }
  0xb3   :  { %v805_v42 = vsel %vm747_vm1, %v804_v40, %v803_v18  ;;  %637 = vmax.xlane.f32.xlu0 %v364_v39  ;;  %vm881_vm1 = vcmask 1041408  }
  0xb4   :  { %v648_v46 = vpop.xlane.xlu1 %647 }
  0xb5   :  { %v692_v47 = vadd.f32 %v648_v46, %v564_v43  ;;  %v494_v48 = vpop.xlane.xlu2 %493  ;;  %v769_v46 = vadd.s32 4294967232, %v1111_v62 }
  0xb6   :  { %v616_v51 = vpop.xlane.xlu0 %615  ;;  %v551_v22 = vmul.f32 0.00390625, %v494_v48 }
  0xb7   :  { %v676_v52 = vadd.f32 %v616_v51, %v548_v45  ;;  %v806_v49 = vperm.slane %v692_v47, %v749_v44 }
  0xb9   :  { %v750_v50 = vperm.slane %v676_v52, %v749_v44  ;;  %v807_v55 = vsel %vm751_vm2, %v806_v49, %v805_v42 }
  0xbb   :  { %v752_v57 = vsel %vm751_vm2, %v750_v50, %v748_v32  ;;  %671 = vmax.xlane.f32.xlu0 %v381_v53 }
  0xbc   :  { %v618_v60 = vpop.xlane.xlu1 %617 }
  0xbd   :  { %v677_v61 = vadd.f32 %v618_v60, %v549_v58  ;;  %v650_v63 = vpop.xlane.xlu2 %649 }
  0xbe   :  { %v526_v56 = vpop.xlane.xlu0 %525  ;;  %v693_v0 = vadd.f32 %v650_v63, %v565_v54 }
  0xbf   :  { %v754_v1 = vperm.slane %v677_v61, %v753_v59  ;;  %v567_v20 = vmul.f32 0.00390625, %v526_v56  ;;  %v773_v61 = vadd.s32 4294967224, %v1111_v62 }
  0xc0   :  { %v808_v2 = vperm.slane %v693_v0, %v753_v59 }
  0xc1   :  { %v756_v3 = vsel %vm755_vm3, %v754_v1, %v752_v57 }
  0xc2   :  { %v809_v4 = vsel %vm755_vm3, %v808_v2, %v807_v55 }
  0xc4   :  { %v528_v6 = vpop.xlane.xlu1 %527 }
  0xc5   :  { %v620_v8 = vpop.xlane.xlu2 %619  ;;  %v568_v34 = vmul.f32 0.00390625, %v528_v6 }
  0xc6   :  { %v496_v9 = vpop.xlane.xlu0 %495  ;;  %v678_v10 = vadd.f32 %v620_v8, %v550_v5 }
  0xc7   :  { %v552_v32 = vmul.f32 0.00390625, %v496_v9  ;;  %v1143_v9 = vadd.s32 4294967216, %v1111_v62 }
  0xc8   :  { %v758_v11 = vperm.slane %v678_v10, %v757_v7 }
  0xca   :  { %v760_v12 = vsel %vm759_vm4, %v758_v11, %v756_v3 }
  0xcc   :  { %v498_v14 = vpop.xlane.xlu1 %497 }
  0xcd   :  { %v530_v15 = vpop.xlane.xlu2 %529  ;;  %v553_v44 = vmul.f32 0.00390625, %v498_v14 }
  0xce   :  { %v652_v16 = vpop.xlane.xlu0 %651  ;;  %v569_v49 = vmul.f32 0.00390625, %v530_v15 }
  0xcf   :  { %v694_v17 = vadd.f32 %v652_v16, %v566_v13 }
  0xd1   :  { %v810_v18 = vperm.slane %v694_v17, %v757_v7 }
  0xd3   :  { %v811_v19 = vsel %vm759_vm4, %v810_v18, %v809_v4 }
  0xd4   :  { %v654_v23 = vpop.xlane.xlu1 %653 }
  0xd5   :  { %v695_v24 = vadd.f32 %v654_v23, %v567_v20  ;;  %v500_v25 = vpop.xlane.xlu2 %499 }
  0xd6   :  { %v622_v26 = vpop.xlane.xlu0 %621  ;;  %v554_v63 = vmul.f32 0.00390625, %v500_v25 }
  0xd7   :  { %v679_v27 = vadd.f32 %v622_v26, %v551_v22  ;;  %v812_v28 = vperm.slane %v695_v24, %v761_v21  ;;  %v705_v22 = vld [vmem:[#allocation7] sm:$0xff] }
  0xd8   :  { %850 = vmatpush.xpose.msra.mxu0 %v705_v22 }
  0xd9   :  { %v762_v29 = vperm.slane %v679_v27, %v761_v21  ;;  %v813_v30 = vsel %vm763_vm5, %v812_v28, %v811_v19 }
  0xdb   :  { %v764_v31 = vsel %vm763_vm5, %v762_v29, %v760_v12 }
  0xdc   :  { %v624_v35 = vpop.xlane.xlu1 %623 }
  0xdd   :  { %v680_v36 = vadd.f32 %v624_v35, %v552_v32  ;;  %v656_v37 = vpop.xlane.xlu2 %655  ;;  %v781_v32 = vadd.s32 4294967208, %v1111_v62 }
  0xde   :  { %v532_v38 = vpop.xlane.xlu0 %531  ;;  %v696_v41 = vadd.f32 %v656_v37, %v568_v34 }
  0xdf   :  { %v766_v39 = vperm.slane %v680_v36, %v765_v33  ;;  %v570_v60 = vmul.f32 0.00390625, %v532_v38  ;;  %v785_v36 = vadd.s32 4294967200, %v1111_v62 }
  0xe0   :  { %v814_v40 = vperm.slane %v696_v41, %v765_v33 }
  0xe1   :  { %v768_v42 = vsel %vm767_vm6, %v766_v39, %v764_v31 }
  0xe2   :  { %v815_v43 = vsel %vm767_vm6, %v814_v40, %v813_v30 }
  0xe4   :  { %v534_v45 = vpop.xlane.xlu1 %533 }
  0xe5   :  { %v626_v47 = vpop.xlane.xlu2 %625  ;;  %v571_v30 = vmul.f32 0.00390625, %v534_v45 }
  0xe6   :  { %v502_v48 = vpop.xlane.xlu0 %501  ;;  %v681_v51 = vadd.f32 %v626_v47, %v553_v44  ;;  %v789_v44 = vadd.s32 4294967192, %v1111_v62 }
  0xe7   :  { %v555_v8 = vmul.f32 0.00390625, %v502_v48 }
  0xe8   :  { %v770_v52 = vperm.slane %v681_v51, %v769_v46  ;;  %v793_v51 = vadd.s32 4294967184, %v1111_v62 }
  0xea   :  { %v772_v53 = vsel %vm771_vm7, %v770_v52, %v768_v42 }
  0xec   :  { %v504_v50 = vpop.xlane.xlu1 %503 }
  0xed   :  { %v536_v55 = vpop.xlane.xlu2 %535  ;;  %v556_v29 = vmul.f32 0.00390625, %v504_v50 }
  0xee   :  { %v658_v57 = vpop.xlane.xlu0 %657  ;;  %v572_v33 = vmul.f32 0.00390625, %v536_v55 }
  0xef   :  { %v697_v58 = vadd.f32 %v658_v57, %v569_v49 }
  0xf1   :  { %v816_v59 = vperm.slane %v697_v58, %v769_v46 }
  0xf3   :  { %v817_v54 = vsel %vm771_vm7, %v816_v59, %v815_v43 }
  0xf4   :  { %v660_v56 = vpop.xlane.xlu1 %659 }
  0xf5   :  { %v698_v0 = vadd.f32 %v660_v56, %v570_v60  ;;  %v506_v1 = vpop.xlane.xlu2 %505 }
  0xf6   :  { %v628_v2 = vpop.xlane.xlu0 %627  ;;  %v557_v31 = vmul.f32 0.00390625, %v506_v1 }
  0xf7   :  { %v682_v3 = vadd.f32 %v628_v2, %v554_v63  ;;  %v818_v4 = vperm.slane %v698_v0, %v773_v61 }
  0xf9   :  { %v774_v5 = vperm.slane %v682_v3, %v773_v61  ;;  %v1140_v6 = vsel %vm775_vm8, %v818_v4, %v817_v54  ;;  %v797_v61 = vadd.s32 4294967176, %v1111_v62 }
  0xfb   :  { %v776_v7 = vsel %vm775_vm8, %v774_v5, %v772_v53 }
  0xfc   :  { %v630_v10 = vpop.xlane.xlu1 %629 }
  0xfd   :  { %v683_v11 = vadd.f32 %v630_v10, %v555_v8  ;;  %v662_v12 = vpop.xlane.xlu2 %661 }
  0xfe   :  { %v538_v13 = vpop.xlane.xlu0 %537  ;;  %v699_v37 = vadd.f32 %v662_v12, %v571_v30 }
  0xff   :  { %v778_v14 = vperm.slane %v683_v11, %v1143_v9  ;;  %v573_v38 = vmul.f32 0.00390625, %v538_v13 }
 0x100   :  { %v820_v57 = vperm.slane %v699_v37, %v1143_v9 }
 0x101   :  { %v780_v15 = vsel %vm779_vm9, %v778_v14, %v776_v7 }
 0x102   :  { %v821_v4 = vsel %vm779_vm9, %v820_v57, %v1140_v6 }
 0x104   :  { %v540_v16 = vpop.xlane.xlu1 %539 }
 0x105   :  { %v632_v17 = vpop.xlane.xlu2 %631  ;;  %v574_v42 = vmul.f32 0.00390625, %v540_v16 }
 0x106   :  { %v508_v18 = vpop.xlane.xlu0 %507  ;;  %v684_v34 = vadd.f32 %v632_v17, %v556_v29 }
 0x107   :  { %v558_v35 = vmul.f32 0.00390625, %v508_v18 }
 0x108   :  { %v782_v49 = vperm.slane %v684_v34, %v781_v32 }
 0x10a   :  { %v784_v1 = vsel %vm783_vm10, %v782_v49, %v780_v15 }
 0x10c   :  { %v510_v19 = vpop.xlane.xlu1 %509 }
 0x10d   :  { %v542_v20 = vpop.xlane.xlu2 %541  ;;  %v559_v41 = vmul.f32 0.00390625, %v510_v19  ;;  %v856_v19 = vld [vmem:[#allocation9] sm:$0xff] }
 0x10e   :  { %v664_v21 = vpop.xlane.xlu0 %663  ;;  %v575_v45 = vmul.f32 0.00390625, %v542_v20  ;;  %876 = vmatpush.msra.mxu1 %v856_v19 }
 0x10f   :  { %v700_v43 = vadd.f32 %v664_v21, %v572_v33 }
 0x111   :  { %v822_v54 = vperm.slane %v700_v43, %v781_v32 }
 0x113   :  { %v823_v9 = vsel %vm783_vm10, %v822_v54, %v821_v4 }
 0x114   :  { %v666_v23 = vpop.xlane.xlu1 %665 }
 0x115   :  { %v512_v24 = vpop.xlane.xlu2 %511  ;;  %v701_v48 = vadd.f32 %v666_v23, %v573_v38 }
 0x116   :  { %v634_v25 = vpop.xlane.xlu0 %633  ;;  %v560_v50 = vmul.f32 0.00390625, %v512_v24 }
 0x117   :  { %v685_v39 = vadd.f32 %v634_v25, %v557_v31  ;;  %v824_v56 = vperm.slane %v701_v48, %v785_v36 }
 0x119   :  { %v786_v58 = vperm.slane %v685_v39, %v785_v36  ;;  %v825_v12 = vsel %vm787_vm11, %v824_v56, %v823_v9 }
 0x11b   :  { %v788_v5 = vsel %vm787_vm11, %v786_v58, %v784_v1 }
 0x11c   :  { %v636_v26 = vpop.xlane.xlu1 %635 }
 0x11d   :  { %v668_v27 = vpop.xlane.xlu2 %667  ;;  %v686_v46 = vadd.f32 %v636_v26, %v558_v35 }
 0x11e   :  { %v544_v28 = vpop.xlane.xlu0 %543  ;;  %v702_v55 = vadd.f32 %v668_v27, %v574_v42 }
 0x11f   :  { %v790_v60 = vperm.slane %v686_v46, %v789_v44  ;;  %v576_v3 = vmul.f32 0.00390625, %v544_v28 }
 0x120   :  { %v826_v2 = vperm.slane %v702_v55, %v789_v44 }
 0x121   :  { %v792_v62 = vsel %vm791_vm12, %v790_v60, %v788_v5 }
 0x122   :  { %v827_v14 = vsel %vm791_vm12, %v826_v2, %v825_v12 }
 0x124   :  { %v670_v47 = vpop.xlane.xlu1 %669 }
 0x125   :  { %v640_v52 = vpop.xlane.xlu2 %639  ;;  %v703_v59 = vadd.f32 %v670_v47, %v575_v45 }
 0x126   :  { %v638_v40 = vpop.xlane.xlu0 %637  ;;  %v688_v63 = vadd.f32 %v640_v52, %v560_v50 }
 0x127   :  { %v687_v53 = vadd.f32 %v638_v40, %v559_v41  ;;  %v828_v7 = vperm.slane %v703_v59, %v793_v51 }
 0x128   :  { %v798_v10 = vperm.slane %v688_v63, %v797_v61 }
 0x129   :  { %v794_v0 = vperm.slane %v687_v53, %v793_v51  ;;  %v829_v16 = vsel %vm795_vm13, %v828_v7, %v827_v14 }
 0x12b   :  { %v796_v13 = vsel %vm795_vm13, %v794_v0, %v792_v62 }
 0x12c   :  { %v800_v6 = vsel %vm799_vm14, %v798_v10, %v796_v13 }
 0x12e   :  { %v672_v8 = vpop.xlane.xlu0 %671 }
 0x12f   :  { %v704_v11 = vadd.f32 %v672_v8, %v576_v3 }
 0x131   :  { %v830_v15 = vperm.slane %v704_v11, %v797_v61 }
 0x133   :  { %v831_v17 = vsel %vm799_vm14, %v830_v15, %v829_v16 }
 0x134   :  { %v833_v18 = vsel %vm832_vm15, %v831_v17, %v800_v6 }
 0x135   :  { %851 = vmatmul.f32.vlgmr.msra.gmra.mxu0 %v833_v18 }
 0x1b2   :  { %v852_v20 = vpop.f32.mrf.mxu0 }
 0x1b3   :  { %v855_v21 = vmax.f32 %v852_v20, 0.0 }
 0x1b5   :  { %925 = vmatmul.msk.f32.vlgmr.msra.gmra.mxu1 %vm857_vm0, %v855_v21 }
 0x232   :  { %v878_v22 = vpop.f32.mrf.mxu1 }
 0x233   :  { %v882_v23 = vsel %vm881_vm1, %v878_v22, -inf }
 0x234   :  { %883 = vmax.xlane.f32.xlu1 %v882_v23 }
 0x2a7   :  { %v884_v24 = vpop.xlane.xlu1 %883 }
 0x2a8   :  { %v885_v25 = vsub.f32 %v878_v22, %v884_v24 }
 0x2aa   :  { %v886_v26 = vmul.f32 1.442695, %v885_v25 }
 0x2ac   :  { %932 = vpow2.f32 %v886_v26 }
 0x2b2   :  { %v933_v27 = vpop.eup %932 }
 0x2b3   :  { %v888_v28 = vsel %vm881_vm1, %v933_v27, 0.0 }
 0x2b4   :  { %889 = vadd.xlane.f32.xlu2 %v888_v28 }
 0x327   :  { %v890_v29 = vpop.xlane.xlu2 %889 }
 0x328   :  { %934 = vrcp.f32 %v890_v29  ;;  %v902_v33 = vand.u32 2147483648, %v890_v29  ;;  %v900_v35 = vand.u32 2147483647, %v890_v29  ;;  %vm896_vm3 = vweird.f32 %v890_v29 }
 0x32a   :  { %v903_v37 = vor.u32 1.1754944e-38, %v902_v33  ;;  %vm901_vm5 = vcmp.eq.f32.partialorder %v900_v35, 8.507059e+37 }
 0x32e   :  { %v935_v30 = vpop.eup %934 }
 0x32f   :  { %v892_v31 = vmul.f32 %v935_v30, %v890_v29  ;;  %vm897_vm2 = vweird.f32 %v935_v30 }
 0x330   :  { %vm898_vm4 = vmor %vm896_vm3, %vm897_vm2 }
 0x331   :  { %v893_v32 = vsub.f32 1.0, %v892_v31 }
 0x333   :  { %v894_v34 = vmul.f32 %v935_v30, %v893_v32 }
 0x335   :  { %v895_v36 = vadd.f32 %v935_v30, %v894_v34 }
 0x337   :  { %v899_v38 = vsel %vm898_vm4, %v935_v30, %v895_v36 }
 0x338   :  { %v904_v41 = vsel %vm901_vm5, %v903_v37, %v899_v38 }
 0x339   :  { %v905_v39 = vmul.f32 %v933_v27, %v904_v41 }
 0x33b   :  { %906 = vst [vmem:[#allocation10] sm:$0x3] %v905_v39 }
 0x33c   :  { %917 = dma.vmem_to_hbm [thread:$0]  %s913_s2, 32, %s915_s30, [#allocation6]  }
 0x33d   :  { %1036 = dma.done.wait [#allocation6], 32  }
 0x33e   :  { %1037 = vsyncadd [#allocation6], 4294967264 }
 0x33f   :  { %922 = vsyncpa [#allocation5], 1 }
 0x340   :  { %923 = vsyncpa [#allocation8], 1 }
 0x341   :  { %924 = vsyncpa [#allocation6], 1 }

</bundles_post_ra>
